<compile_context>
chip_gen: v7x
topology: tpu7x:2x2x1
jax: 0.10.0
libtpu: 0.0.40
codegen_flags: <defaults>
</compile_context>

<pallas_src>
import functools

import jax
import jax.numpy as jnp
from jax import lax
from jax.experimental import pallas as pl
from jax.experimental.pallas import tpu as pltpu


# ----------------------------------------------------------------------------
# Constant-buffer layout (pure Python; derived only from static dims)
# ----------------------------------------------------------------------------

def _round_up(v, m):
  return ((v + m - 1) // m) * m


def _const_spec(num_nodes, num_features, emb, latent, batch_size):
  """Ordered list of (name, (rows, cols)) for every packed constant."""
  n_total = batch_size * num_nodes
  e2, e3 = emb[2], emb[3]
  return (
      ("w1", (num_features, emb[0])), ("b1", (1, emb[0])),
      ("w2", (emb[0], emb[1])),       ("b2", (1, emb[1])),
      ("w3", (emb[1], e2)),           ("b3", (1, e2)),
      ("we", (e2, num_nodes * latent)), ("be", (1, latent)),
      ("wd", (latent, num_nodes * e3)), ("bd", (1, num_nodes * e3)),
      ("w4", (e3, emb[4])),           ("b4", (1, emb[4])),
      ("w5", (emb[4], emb[5])),       ("b5", (1, emb[5])),
      ("w6", (emb[5], 1)),            ("b6", (1, 1)),
      ("m_enc", (n_total, num_nodes * latent)),
      ("r_enc", (num_nodes * latent, latent)),
      ("pool", (batch_size, n_total)),
      ("unpool", (n_total, batch_size)),
      ("m_dec", (n_total, num_nodes * e3)),
      ("r_dec", (num_nodes * e3, e3)),
  )


def _const_layout(spec):
  """Sublane-aligned row offsets and lane-padded width for the packed buffer."""
  layout = {}
  off = 0
  width = 0
  for name, (r, c) in spec:
    layout[name] = (off, r, c)
    off += _round_up(r, 8)          # keep every segment sublane-aligned
    width = max(width, c)
  rows = max(_round_up(off, 8), 8)
  width = max(_round_up(width, 128), 128)
  return layout, rows, width


def _build_masks(batch_size, num_nodes, emb3, latent):
  """Static selection / pooling matrices (built once, outside the kernel)."""
  n_total = batch_size * num_nodes
  r = jnp.arange(n_total)[:, None]

  c_enc = jnp.arange(num_nodes * latent)[None, :]
  m_enc = ((r % num_nodes) == (c_enc // latent)).astype(jnp.float32)
  r_enc = ((jnp.arange(num_nodes * latent)[:, None] % latent)
           == jnp.arange(latent)[None, :]).astype(jnp.float32)

  pool = (jnp.arange(batch_size)[:, None]
          == (jnp.arange(n_total)[None, :] // num_nodes)).astype(jnp.float32)
  unpool = pool.T

  c_dec = jnp.arange(num_nodes * emb3)[None, :]
  m_dec = ((r % num_nodes) == (c_dec // emb3)).astype(jnp.float32)
  r_dec = ((jnp.arange(num_nodes * emb3)[:, None] % emb3)
           == jnp.arange(emb3)[None, :]).astype(jnp.float32)

  return {"m_enc": m_enc, "r_enc": r_enc, "pool": pool, "unpool": unpool,
          "m_dec": m_dec, "r_dec": r_dec}


def pack_constants(params, *, batch_size, num_nodes, num_features, emb,
                   latent_dim):
  """One-time host-side packing of all weights/biases/masks into one buffer."""
  e2, e3 = emb[2], emb[3]
  w1, b1 = params["conv1"]; w2, b2 = params["conv2"]; w3, b3 = params["conv3"]
  we, be = params["encoder"]; wd, bd = params["decoder"]
  w4, b4 = params["conv4"]; w5, b5 = params["conv5"]; w6, b6 = params["conv6"]

  # Re-layout of the encoder weight so the flatten+Linear fuses into matmuls:
  #   we_big[f, i*latent + l] == we[i*emb2 + f, l]
  we_big = we.reshape(num_nodes, e2, latent_dim).transpose(1, 0, 2)
  we_big = we_big.reshape(e2, num_nodes * latent_dim)

  arrays = {
      "w1": w1, "b1": b1.reshape(1, -1),
      "w2": w2, "b2": b2.reshape(1, -1),
      "w3": w3, "b3": b3.reshape(1, -1),
      "we": we_big, "be": be.reshape(1, -1),
      "wd": wd, "bd": bd.reshape(1, -1),
      "w4": w4, "b4": b4.reshape(1, -1),
      "w5": w5, "b5": b5.reshape(1, -1),
      "w6": w6, "b6": b6.reshape(1, -1),
  }
  arrays.update(_build_masks(batch_size, num_nodes, e3, latent_dim))

  spec = _const_spec(num_nodes, num_features, emb, latent_dim, batch_size)
  layout, rows, width = _const_layout(spec)

  buf = jnp.zeros((rows, width), jnp.float32)
  for name, (r, c) in spec:
    off, _, _ = layout[name]
    buf = buf.at[off:off + r, :c].set(arrays[name].astype(jnp.float32))
  return buf


# ----------------------------------------------------------------------------
# Fused forward kernel (3 inputs, 1 output, grid=())
# ----------------------------------------------------------------------------

def _fused_forward_kernel(a_ref, x_ref, c_ref, o_ref, *, layout):
  f32 = jnp.float32

  def get(name):
    off, r, c = layout[name]
    return c_ref[off:off + r, 0:c]           # static, sublane-aligned VMEM view

  # Load A_hat once; reused by all six GCN layers.
  a = a_ref[...]

  def gcn(h, w, b, relu):
    # Pick association order so the O(n_total^2) matmul uses min(fi, fo)
    # channels.  (bf16 operand casts would go here for v6e/v7x at scale; kept
    # f32 at toy sizes to preserve exact numerics.)
    fi, fo = w.shape
    if fo <= fi:
      out = jnp.dot(a, jnp.dot(h, w, preferred_element_type=f32),
                    preferred_element_type=f32)
    else:
      out = jnp.dot(jnp.dot(a, h, preferred_element_type=f32), w,
                    preferred_element_type=f32)
    out = out + b
    return jnp.maximum(out, 0.0) if relu else out

  # ---------------- GCN encoder stack ----------------
  h = gcn(x_ref[...], get("w1"), get("b1"), relu=True)
  h = gcn(h, get("w2"), get("b2"), relu=True)
  h = gcn(h, get("w3"), get("b3"), relu=False)            # (n_total, emb2)

  # ---------------- flatten + encoder Linear (masked matmuls) --------------
  y = jnp.dot(h, get("we"), preferred_element_type=f32) * get("m_enc")
  z = jnp.dot(y, get("r_enc"), preferred_element_type=f32)       # (n_total, L)
  enc = jnp.dot(get("pool"), z, preferred_element_type=f32) + get("be")
  # TODO(synk): Encoder class body not in the source file; assumed Linear+ReLU.
  enc = jnp.maximum(enc, 0.0)

  # ---------------- decoder Linear + un-flatten ----------------
  dec = jnp.dot(enc, get("wd"), preferred_element_type=f32) + get("bd")
  # TODO(synk): Decoder class body not in the source file; assumed plain Linear.
  bcast = jnp.dot(get("unpool"), dec, preferred_element_type=f32) * get("m_dec")
  h = jnp.dot(bcast, get("r_dec"), preferred_element_type=f32)   # (n_total, e3)
  h = jnp.maximum(h, 0.0)                  # post-view ReLU (commutes with view)

  # ---------------- GCN decoder stack ----------------
  h = gcn(h, get("w4"), get("b4"), relu=True)
  h = gcn(h, get("w5"), get("b5"), relu=True)
  h = gcn(h, get("w6"), get("b6"), relu=True)              # (n_total, 1)

  # Final view(-1, num_nodes) is a free reshape done in the wrapper.
  o_ref[...] = h.astype(o_ref.dtype)


_VMEM = pl.BlockSpec(memory_space=pltpu.MemorySpace.VMEM)


def fused_forward(a_hat, x, const_buf, *, batch_size, num_nodes, num_features,
                  emb, latent_dim):
  n_total = batch_size * num_nodes
  spec = _const_spec(num_nodes, num_features, emb, latent_dim, batch_size)
  layout, _, _ = _const_layout(spec)

  # Advisory cost estimate (fused kernel).
  def mm(m, k, n):
    return 2 * m * k * n
  flops = 0
  gcn_dims = [(num_features, emb[0]), (emb[0], emb[1]), (emb[1], emb[2]),
              (emb[3], emb[4]), (emb[4], emb[5]), (emb[5], 1)]
  for fi, fo in gcn_dims:
    flops += mm(n_total, fi, fo) + mm(n_total, n_total, min(fi, fo))
  flops += mm(n_total, emb[2], num_nodes * latent_dim)
  flops += mm(n_total, num_nodes * latent_dim, latent_dim)
  flops += mm(batch_size, n_total, latent_dim)
  flops += mm(batch_size, latent_dim, num_nodes * emb[3])
  flops += mm(n_total, batch_size, num_nodes * emb[3])
  flops += mm(n_total, num_nodes * emb[3], emb[3])
  bytes_accessed = (a_hat.size + x.size + const_buf.size + n_total) * 4

  kernel = functools.partial(_fused_forward_kernel, layout=layout)

  out = pl.pallas_call(
      kernel,
      out_shape=jax.ShapeDtypeStruct((n_total, 1), jnp.float32),
      in_specs=[_VMEM, _VMEM, _VMEM],
      out_specs=_VMEM,
      cost_estimate=pl.CostEstimate(flops=flops, transcendentals=0,
                                    bytes_accessed=bytes_accessed),
  )(a_hat, x, const_buf)

  # x.view(-1, num_nodes): free reshape on a tiny array.
  return out.reshape(batch_size, num_nodes)


# ----------------------------------------------------------------------------
# Glue: dense normalized adjacency from edge_index (PyG GCNConv convention)
# ----------------------------------------------------------------------------

def normalized_adjacency(edge_index, num_nodes_total):
  # edge_index: (2, E) int32, row 0 = source (j), row 1 = target (i).
  # Built with a one-hot matmul (MXU) instead of a serialized scatter-add.
  src, dst = edge_index[0], edge_index[1]
  oh_dst = jax.nn.one_hot(dst, num_nodes_total, dtype=jnp.float32)   # (E, n)
  oh_src = jax.nn.one_hot(src, num_nodes_total, dtype=jnp.float32)   # (E, n)
  a = jnp.dot(oh_dst.T, oh_src)                      # a[i, j] = #edges j -> i
  a = a + jnp.eye(num_nodes_total, dtype=jnp.float32)        # self loops
  deg = jnp.sum(a, axis=1)
  d_inv_sqrt = jnp.where(deg > 0, lax.rsqrt(deg), 0.0)
  return a * d_inv_sqrt[:, None] * d_inv_sqrt[None, :]


# ----------------------------------------------------------------------------
# Parameters (deterministic in-script init; shapes match module __init__)
# ----------------------------------------------------------------------------

def init_params(num_nodes, num_features, emb, latent_dim, key):
  def dense(key, fan_in, fan_out):
    scale = jnp.sqrt(2.0 / (fan_in + fan_out)).astype(jnp.float32)
    w = scale * jax.random.normal(key, (fan_in, fan_out), jnp.float32)
    b = jnp.zeros((fan_out,), jnp.float32)
    return w, b

  keys = jax.random.split(key, 8)
  return {
      "conv1": dense(keys[0], num_features, emb[0]),
      "conv2": dense(keys[1], emb[0], emb[1]),
      "conv3": dense(keys[2], emb[1], emb[2]),
      "encoder": dense(keys[3], num_nodes * emb[2], latent_dim),
      "decoder": dense(keys[4], latent_dim, num_nodes * emb[3]),
      "conv4": dense(keys[5], emb[3], emb[4]),
      "conv5": dense(keys[6], emb[4], emb[5]),
      "conv6": dense(keys[7], emb[5], 1),
  }


# ----------------------------------------------------------------------------
# Forward pass (mirrors model3_variant5.forward)
# ----------------------------------------------------------------------------

@functools.partial(jax.jit,
                   static_argnames=("batch_size", "num_nodes", "emb",
                                    "latent_dim"))
def model3_variant5_forward(const_buf, x, edge_index, *, batch_size,
                            batch_index, num_nodes, emb, latent_dim):
  del batch_index  # unused in the reference forward pass
  n_total = x.shape[0]
  a_hat = normalized_adjacency(edge_index, n_total)
  return fused_forward(a_hat, x, const_buf, batch_size=batch_size,
                       num_nodes=num_nodes, num_features=x.shape[1],
                       emb=emb, latent_dim=latent_dim)


# ----------------------------------------------------------------------------
# Main
# ----------------------------------------------------------------------------

if __name__ == "__main__":
  num_nodes = 8
  num_features = 4
  emb = (16, 8, 4, 4, 8, 16)      # embedding_sequence
  latent_dim = 8
  batch_size = 2
  n_total = batch_size * num_nodes

  key = jax.random.PRNGKey(0)
  k_x, k_p = jax.random.split(key)

  # node features for the batched graph: (batch*num_nodes, num_features)
  x = jax.random.normal(k_x, (n_total, num_features), jnp.float32)

  # undirected ring graph per graph in the batch, batched with node offsets
  edges = []
  for g in range(batch_size):
    off = g * num_nodes
    for i in range(num_nodes):
      j = (i + 1) % num_nodes
      edges.append((off + i, off + j))
      edges.append((off + j, off + i))
  edge_index = jnp.array(edges, dtype=jnp.int32).T   # (2, E)

  batch_index = jnp.repeat(jnp.arange(batch_size, dtype=jnp.int32), num_nodes)

  params = init_params(num_nodes, num_features, emb, latent_dim, k_p)

  # One-time host-side packing of all weights/biases/masks into one buffer
  # (hoisted out of the per-call hot path).
  const_buf = pack_constants(params, batch_size=batch_size,
                             num_nodes=num_nodes, num_features=num_features,
                             emb=emb, latent_dim=latent_dim)
  const_buf = jax.block_until_ready(const_buf)

  out = model3_variant5_forward(const_buf, x, edge_index,
                                batch_size=batch_size,
                                batch_index=batch_index,
                                num_nodes=num_nodes, emb=emb,
                                latent_dim=latent_dim)
  out = jax.block_until_ready(out)

  assert out.shape == (batch_size, num_nodes), out.shape
  print("KERNEL_OK")
</pallas_src>

<mosaic_0001>
module attributes {stable_mosaic.version = 11 : i64} {
  func.func @_fused_forward_kernel(%arg0: memref<16x16xf32, #tpu.memory_space<vmem>>, %arg1: memref<16x4xf32, #tpu.memory_space<vmem>>, %arg2: memref<296x128xf32, #tpu.memory_space<vmem>>, %arg3: memref<16x1xf32, #tpu.memory_space<vmem>>) attributes {dimension_semantics = [], scalar_prefetch = 0 : i64, scratch_operands = 0 : i64, tpu.core_type = #tpu.core_type<tc>} {
    %c0 = arith.constant 0 : index
    %c0_0 = arith.constant 0 : index
    %0 = vector.load %arg0[%c0, %c0_0] : memref<16x16xf32, #tpu.memory_space<vmem>>, vector<16x16xf32>
    %c0_1 = arith.constant 0 : index
    %c0_2 = arith.constant 0 : index
    %1 = vector.load %arg1[%c0_1, %c0_2] : memref<16x4xf32, #tpu.memory_space<vmem>>, vector<16x4xf32>
    %c0_3 = arith.constant 0 : index
    %c0_4 = arith.constant 0 : index
    %2 = vector.load %arg2[%c0_3, %c0_4] : memref<296x128xf32, #tpu.memory_space<vmem>>, vector<4x16xf32>
    %c8 = arith.constant 8 : index
    %c0_5 = arith.constant 0 : index
    %3 = vector.load %arg2[%c8, %c0_5] : memref<296x128xf32, #tpu.memory_space<vmem>>, vector<1x16xf32>
    %cst = arith.constant dense<0.000000e+00> : vector<16x4xf32>
    %4 = tpu.matmul %0, %1, %cst {dimension_numbers = #tpu.dot_dimension_numbers<[1], [0], [0], [1], [0, 0, 1, 1], [], []>} : vector<16x16xf32>, vector<16x4xf32>, vector<16x4xf32> -> vector<16x4xf32>
    %cst_6 = arith.constant dense<0.000000e+00> : vector<16x16xf32>
    %5 = tpu.matmul %4, %2, %cst_6 {dimension_numbers = #tpu.dot_dimension_numbers<[1], [0], [0], [1], [0, 0, 1, 1], [], []>} : vector<16x4xf32>, vector<4x16xf32>, vector<16x16xf32> -> vector<16x16xf32>
    %6 = vector.broadcast %3 : vector<1x16xf32> to vector<16x16xf32>
    %7 = arith.addf %5, %6 : vector<16x16xf32>
    %cst_7 = arith.constant 0.000000e+00 : f32
    %8 = vector.broadcast %cst_7 : f32 to vector<16x16xf32>
    %9 = arith.maximumf %7, %8 : vector<16x16xf32>
    %c16 = arith.constant 16 : index
    %c0_8 = arith.constant 0 : index
    %10 = vector.load %arg2[%c16, %c0_8] : memref<296x128xf32, #tpu.memory_space<vmem>>, vector<16x8xf32>
    %c32 = arith.constant 32 : index
    %c0_9 = arith.constant 0 : index
    %11 = vector.load %arg2[%c32, %c0_9] : memref<296x128xf32, #tpu.memory_space<vmem>>, vector<1x8xf32>
    %cst_10 = arith.constant dense<0.000000e+00> : vector<16x8xf32>
    %12 = tpu.matmul %9, %10, %cst_10 {dimension_numbers = #tpu.dot_dimension_numbers<[1], [0], [0], [1], [0, 0, 1, 1], [], []>} : vector<16x16xf32>, vector<16x8xf32>, vector<16x8xf32> -> vector<16x8xf32>
    %cst_11 = arith.constant dense<0.000000e+00> : vector<16x8xf32>
    %13 = tpu.matmul %0, %12, %cst_11 {dimension_numbers = #tpu.dot_dimension_numbers<[1], [0], [0], [1], [0, 0, 1, 1], [], []>} : vector<16x16xf32>, vector<16x8xf32>, vector<16x8xf32> -> vector<16x8xf32>
    %14 = vector.broadcast %11 : vector<1x8xf32> to vector<16x8xf32>
    %15 = arith.addf %13, %14 : vector<16x8xf32>
    %cst_12 = arith.constant 0.000000e+00 : f32
    %16 = vector.broadcast %cst_12 : f32 to vector<16x8xf32>
    %17 = arith.maximumf %15, %16 : vector<16x8xf32>
    %c40 = arith.constant 40 : index
    %c0_13 = arith.constant 0 : index
    %18 = vector.load %arg2[%c40, %c0_13] : memref<296x128xf32, #tpu.memory_space<vmem>>, vector<8x4xf32>
    %c48 = arith.constant 48 : index
    %c0_14 = arith.constant 0 : index
    %19 = vector.load %arg2[%c48, %c0_14] : memref<296x128xf32, #tpu.memory_space<vmem>>, vector<1x4xf32>
    %cst_15 = arith.constant dense<0.000000e+00> : vector<16x4xf32>
    %20 = tpu.matmul %17, %18, %cst_15 {dimension_numbers = #tpu.dot_dimension_numbers<[1], [0], [0], [1], [0, 0, 1, 1], [], []>} : vector<16x8xf32>, vector<8x4xf32>, vector<16x4xf32> -> vector<16x4xf32>
    %cst_16 = arith.constant dense<0.000000e+00> : vector<16x4xf32>
    %21 = tpu.matmul %0, %20, %cst_16 {dimension_numbers = #tpu.dot_dimension_numbers<[1], [0], [0], [1], [0, 0, 1, 1], [], []>} : vector<16x16xf32>, vector<16x4xf32>, vector<16x4xf32> -> vector<16x4xf32>
    %22 = vector.broadcast %19 : vector<1x4xf32> to vector<16x4xf32>
    %23 = arith.addf %21, %22 : vector<16x4xf32>
    %c56 = arith.constant 56 : index
    %c0_17 = arith.constant 0 : index
    %24 = vector.load %arg2[%c56, %c0_17] : memref<296x128xf32, #tpu.memory_space<vmem>>, vector<4x64xf32>
    %cst_18 = arith.constant dense<0.000000e+00> : vector<16x64xf32>
    %25 = tpu.matmul %23, %24, %cst_18 {dimension_numbers = #tpu.dot_dimension_numbers<[1], [0], [0], [1], [0, 0, 1, 1], [], []>} : vector<16x4xf32>, vector<4x64xf32>, vector<16x64xf32> -> vector<16x64xf32>
    %c144 = arith.constant 144 : index
    %c0_19 = arith.constant 0 : index
    %26 = vector.load %arg2[%c144, %c0_19] : memref<296x128xf32, #tpu.memory_space<vmem>>, vector<16x64xf32>
    %27 = arith.mulf %25, %26 : vector<16x64xf32>
    %c160 = arith.constant 160 : index
    %c0_20 = arith.constant 0 : index
    %28 = vector.load %arg2[%c160, %c0_20] : memref<296x128xf32, #tpu.memory_space<vmem>>, vector<64x8xf32>
    %cst_21 = arith.constant dense<0.000000e+00> : vector<16x8xf32>
    %29 = tpu.matmul %27, %28, %cst_21 {dimension_numbers = #tpu.dot_dimension_numbers<[1], [0], [0], [1], [0, 0, 1, 1], [], []>} : vector<16x64xf32>, vector<64x8xf32>, vector<16x8xf32> -> vector<16x8xf32>
    %c224 = arith.constant 224 : index
    %c0_22 = arith.constant 0 : index
    %30 = vector.load %arg2[%c224, %c0_22] : memref<296x128xf32, #tpu.memory_space<vmem>>, vector<2x16xf32>
    %cst_23 = arith.constant dense<0.000000e+00> : vector<2x8xf32>
    %31 = tpu.matmul %30, %29, %cst_23 {dimension_numbers = #tpu.dot_dimension_numbers<[1], [0], [0], [1], [0, 0, 1, 1], [], []>} : vector<2x16xf32>, vector<16x8xf32>, vector<2x8xf32> -> vector<2x8xf32>
    %c64 = arith.constant 64 : index
    %c0_24 = arith.constant 0 : index
    %32 = vector.load %arg2[%c64, %c0_24] : memref<296x128xf32, #tpu.memory_space<vmem>>, vector<1x8xf32>
    %33 = vector.broadcast %32 : vector<1x8xf32> to vector<2x8xf32>
    %34 = arith.addf %31, %33 : vector<2x8xf32>
    %cst_25 = arith.constant 0.000000e+00 : f32
    %35 = vector.broadcast %cst_25 : f32 to vector<2x8xf32>
    %36 = arith.maximumf %34, %35 : vector<2x8xf32>
    %c72 = arith.constant 72 : index
    %c0_26 = arith.constant 0 : index
    %37 = vector.load %arg2[%c72, %c0_26] : memref<296x128xf32, #tpu.memory_space<vmem>>, vector<8x32xf32>
    %cst_27 = arith.constant dense<0.000000e+00> : vector<2x32xf32>
    %38 = tpu.matmul %36, %37, %cst_27 {dimension_numbers = #tpu.dot_dimension_numbers<[1], [0], [0], [1], [0, 0, 1, 1], [], []>} : vector<2x8xf32>, vector<8x32xf32>, vector<2x32xf32> -> vector<2x32xf32>
    %c80 = arith.constant 80 : index
    %c0_28 = arith.constant 0 : index
    %39 = vector.load %arg2[%c80, %c0_28] : memref<296x128xf32, #tpu.memory_space<vmem>>, vector<1x32xf32>
    %40 = vector.broadcast %39 : vector<1x32xf32> to vector<2x32xf32>
    %41 = arith.addf %38, %40 : vector<2x32xf32>
    %c232 = arith.constant 232 : index
    %c0_29 = arith.constant 0 : index
    %42 = vector.load %arg2[%c232, %c0_29] : memref<296x128xf32, #tpu.memory_space<vmem>>, vector<16x2xf32>
    %cst_30 = arith.constant dense<0.000000e+00> : vector<16x32xf32>
    %43 = tpu.matmul %42, %41, %cst_30 {dimension_numbers = #tpu.dot_dimension_numbers<[1], [0], [0], [1], [0, 0, 1, 1], [], []>} : vector<16x2xf32>, vector<2x32xf32>, vector<16x32xf32> -> vector<16x32xf32>
    %c248 = arith.constant 248 : index
    %c0_31 = arith.constant 0 : index
    %44 = vector.load %arg2[%c248, %c0_31] : memref<296x128xf32, #tpu.memory_space<vmem>>, vector<16x32xf32>
    %45 = arith.mulf %43, %44 : vector<16x32xf32>
    %c264 = arith.constant 264 : index
    %c0_32 = arith.constant 0 : index
    %46 = vector.load %arg2[%c264, %c0_32] : memref<296x128xf32, #tpu.memory_space<vmem>>, vector<32x4xf32>
    %cst_33 = arith.constant dense<0.000000e+00> : vector<16x4xf32>
    %47 = tpu.matmul %45, %46, %cst_33 {dimension_numbers = #tpu.dot_dimension_numbers<[1], [0], [0], [1], [0, 0, 1, 1], [], []>} : vector<16x32xf32>, vector<32x4xf32>, vector<16x4xf32> -> vector<16x4xf32>
    %cst_34 = arith.constant 0.000000e+00 : f32
    %48 = vector.broadcast %cst_34 : f32 to vector<16x4xf32>
    %49 = arith.maximumf %47, %48 : vector<16x4xf32>
    %c88 = arith.constant 88 : index
    %c0_35 = arith.constant 0 : index
    %50 = vector.load %arg2[%c88, %c0_35] : memref<296x128xf32, #tpu.memory_space<vmem>>, vector<4x8xf32>
    %c96 = arith.constant 96 : index
    %c0_36 = arith.constant 0 : index
    %51 = vector.load %arg2[%c96, %c0_36] : memref<296x128xf32, #tpu.memory_space<vmem>>, vector<1x8xf32>
    %cst_37 = arith.constant dense<0.000000e+00> : vector<16x4xf32>
    %52 = tpu.matmul %0, %49, %cst_37 {dimension_numbers = #tpu.dot_dimension_numbers<[1], [0], [0], [1], [0, 0, 1, 1], [], []>} : vector<16x16xf32>, vector<16x4xf32>, vector<16x4xf32> -> vector<16x4xf32>
    %cst_38 = arith.constant dense<0.000000e+00> : vector<16x8xf32>
    %53 = tpu.matmul %52, %50, %cst_38 {dimension_numbers = #tpu.dot_dimension_numbers<[1], [0], [0], [1], [0, 0, 1, 1], [], []>} : vector<16x4xf32>, vector<4x8xf32>, vector<16x8xf32> -> vector<16x8xf32>
    %54 = vector.broadcast %51 : vector<1x8xf32> to vector<16x8xf32>
    %55 = arith.addf %53, %54 : vector<16x8xf32>
    %cst_39 = arith.constant 0.000000e+00 : f32
    %56 = vector.broadcast %cst_39 : f32 to vector<16x8xf32>
    %57 = arith.maximumf %55, %56 : vector<16x8xf32>
    %c104 = arith.constant 104 : index
    %c0_40 = arith.constant 0 : index
    %58 = vector.load %arg2[%c104, %c0_40] : memref<296x128xf32, #tpu.memory_space<vmem>>, vector<8x16xf32>
    %c112 = arith.constant 112 : index
    %c0_41 = arith.constant 0 : index
    %59 = vector.load %arg2[%c112, %c0_41] : memref<296x128xf32, #tpu.memory_space<vmem>>, vector<1x16xf32>
    %cst_42 = arith.constant dense<0.000000e+00> : vector<16x8xf32>
    %60 = tpu.matmul %0, %57, %cst_42 {dimension_numbers = #tpu.dot_dimension_numbers<[1], [0], [0], [1], [0, 0, 1, 1], [], []>} : vector<16x16xf32>, vector<16x8xf32>, vector<16x8xf32> -> vector<16x8xf32>
    %cst_43 = arith.constant dense<0.000000e+00> : vector<16x16xf32>
    %61 = tpu.matmul %60, %58, %cst_43 {dimension_numbers = #tpu.dot_dimension_numbers<[1], [0], [0], [1], [0, 0, 1, 1], [], []>} : vector<16x8xf32>, vector<8x16xf32>, vector<16x16xf32> -> vector<16x16xf32>
    %62 = vector.broadcast %59 : vector<1x16xf32> to vector<16x16xf32>
    %63 = arith.addf %61, %62 : vector<16x16xf32>
    %cst_44 = arith.constant 0.000000e+00 : f32
    %64 = vector.broadcast %cst_44 : f32 to vector<16x16xf32>
    %65 = arith.maximumf %63, %64 : vector<16x16xf32>
    %c120 = arith.constant 120 : index
    %c0_45 = arith.constant 0 : index
    %66 = vector.load %arg2[%c120, %c0_45] : memref<296x128xf32, #tpu.memory_space<vmem>>, vector<16x1xf32>
    %c136 = arith.constant 136 : index
    %c0_46 = arith.constant 0 : index
    %67 = vector.load %arg2[%c136, %c0_46] : memref<296x128xf32, #tpu.memory_space<vmem>>, vector<1x1xf32>
    %cst_47 = arith.constant dense<0.000000e+00> : vector<16x1xf32>
    %68 = tpu.matmul %65, %66, %cst_47 {dimension_numbers = #tpu.dot_dimension_numbers<[1], [0], [0], [1], [0, 0, 1, 1], [], []>} : vector<16x16xf32>, vector<16x1xf32>, vector<16x1xf32> -> vector<16x1xf32>
    %cst_48 = arith.constant dense<0.000000e+00> : vector<16x1xf32>
    %69 = tpu.matmul %0, %68, %cst_48 {dimension_numbers = #tpu.dot_dimension_numbers<[1], [0], [0], [1], [0, 0, 1, 1], [], []>} : vector<16x16xf32>, vector<16x1xf32>, vector<16x1xf32> -> vector<16x1xf32>
    %70 = vector.broadcast %67 : vector<1x1xf32> to vector<16x1xf32>
    %71 = arith.addf %69, %70 : vector<16x1xf32>
    %cst_49 = arith.constant 0.000000e+00 : f32
    %72 = vector.broadcast %cst_49 : f32 to vector<16x1xf32>
    %73 = arith.maximumf %71, %72 : vector<16x1xf32>
    %c0_50 = arith.constant 0 : index
    %c0_51 = arith.constant 0 : index
    %74 = vector.load %arg3[%c0_50, %c0_51] : memref<16x1xf32, #tpu.memory_space<vmem>>, vector<16x1xf32>
    tpu.vector_store %arg3[%c0_50, %c0_51], %73 {strides = array<i32>} : memref<16x1xf32, #tpu.memory_space<vmem>>, vector<16x1xf32>,
    return
  }
}

</mosaic_0001>

<bundles_post_ra>
// kernel: model3_variant5_forward.1
= control target key start
LH: loop header
LB: loop body
LE: loop exit
PB: predicated region body
PF: predicated region fallthrough
CT: control target
= control target key end

     0   :  { %vm20_vm0 = vcmask 130048   ;;  %vm113_vm1 = vcmask 1043456   ;;  %vm106_vm2 = vcmask 31744   ;;  %vm361_vm3 = vcmask 64512   ;;  %s2052_s1 = inlined_call_operand.vmem [shape: f32[16,4], index: 1, kind: input, shape index: {}]   ;;  %s2053_s0 = inlined_call_operand.vmem [shape: f32[16,16], index: 0, kind: input, shape index: {}]   ;;  %s2054_s2 = inlined_call_operand.vmem [shape: f32[296,128], index: 2, kind: input, shape index: {}]   ;;  %s2055_s3 = inlined_call_operand.vmem [shape: f32[16,1], index: 3, kind: output, shape index: {}]  }
   0x1   :  { %v16_v0 = vld [vmem:[%s2052_s1] sm:$0xff]  ;;  %v17_v1 = vld [vmem:[%s2052_s1 + $0x8] sm:$0xff]  ;;  %v194_v8 = vld [vmem:[%s2054_s2 + $0x10] sm:$0xff]  ;;  %vm619_vm4 = vcmask 523264   ;;  %v1850_v56 = vmov 0.0|0.0   ;;  %vm1851_vm5 = vmmov 0  }
   0x2   :  { %v1882_v2 = vld [vmem:[%s2053_s0] sm:$0xff]  ;;  %v1788_v3 = vpack.c.bf16 %v17_v1, %v16_v0  ;;  %v1889_v4 = vld [vmem:[%s2053_s0 + $0x8] sm:$0xff]  ;;  %v195_v9 = vld [vmem:[%s2054_s2 + $0x18] sm:$0xff]  ;;  %v1852_v57 = vmov 0.0   ;;  %vm862_vm6 = vcmask 15360   ;;  %vm869_vm7 = vcmask 1041408  }
   0x3   :  { %1664 = vmatprep.mubr.msk.f32.mxu0 %vm20_vm0, %v1882_v2  ;;  %v18_v5 = vld [vmem:[%s2054_s2] sm:$0xf]  ;;  %v1792_v10 = vpack.c.bf16 %v195_v9, %v194_v8  ;;  %v1545_v11 = vld [vmem:[%s2054_s2 + $0x8] ss:$0 sm:$0xff]  ;;  %v522_v32 = vld [vmem:[%s2054_s2 + $0x38] sm:$0xf] }
   0x4   :  { %1789 = vmatprep.subr.bf16.mxu0 %v1788_v3  ;;  %1667 = vmatprep.subr.msk.mxu1 %vm113_vm1, %v18_v5  ;;  %v359_v21 = vld [vmem:[%s2054_s2 + $0x28] sm:$0xff]  ;;  %v1551_v22 = vld [vmem:[%s2054_s2 + $0x20] ss:$0 sm:$0xff]  ;;  %v613_v35 = vld [vmem:[%s2054_s2 + $0xb0] sm:$0xff]  ;;  %vm956_vm8 = vcmask 261120   ;;  %vm1536_vm9 = vcmask 7168  }
   0x5   :  { %1791 = vmatpush3.bf16.msra.mxu0 %v1788_v3  ;;  %1668 = vmatpush3.msk.msra.mxu1 %vm113_vm1, %v18_v5  ;;  %v611_v33 = vld [vmem:[%s2054_s2 + $0xa0] sm:$0xff]  ;;  %v612_v34 = vld [vmem:[%s2054_s2 + $0xa8] sm:$0xff]  ;;  %v614_v37 = vld [vmem:[%s2054_s2 + $0xb8] sm:$0xff] }
   0x6   :  { %1793 = vmatprep.subr.bf16.mxu1 %v1792_v10  ;;  %v1804_v36 = vpack.c.bf16 %v612_v34, %v611_v33  ;;  %v1808_v38 = vpack.c.bf16 %v614_v37, %v613_v35  ;;  %v615_v39 = vld [vmem:[%s2054_s2 + $0xc0] sm:$0xff]  ;;  %v616_v40 = vld [vmem:[%s2054_s2 + $0xc8] sm:$0xff]  ;;  %v1556_v42 = vld [vmem:[%s2054_s2 + $0x30] ss:$0 sm:$0xff] }
   0x7   :  { %v1812_v41 = vpack.c.bf16 %v616_v40, %v615_v39  ;;  %v617_v47 = vld [vmem:[%s2054_s2 + $0xd0] sm:$0xff]  ;;  %v618_v48 = vld [vmem:[%s2054_s2 + $0xd8] sm:$0xff]  ;;  %v701_v61 = vld [vmem:[%s2054_s2 + $0xe0] sm:$0x3] }
   0x8   :  { %1665 = vmatmul.mubr.msk.f32.vlgmr.msra.gmra.mrb[0].mxu0 %vm20_vm0, %v1889_v4  ;;  %v1816_v49 = vpack.c.bf16 %v618_v48, %v617_v47  ;;  %v607_v50 = vld [vmem:[%s2054_s2 + $0x90] sm:$0xff]  ;;  %v608_v52 = vld [vmem:[%s2054_s2 + $0x98] sm:$0xff]  ;;  %v781_v62 = vld [vmem:[%s2054_s2 + $0x48] sm:$0xff] }
   0x9   :  { %1683 = vmatprep.mubr.msk.f32.mxu0 %vm20_vm0, %v1882_v2  ;;  %v1564_v63 = vld [vmem:[%s2054_s2 + $0x40] ss:$0 sm:$0xff]  ;;  %v952_v8 = vld [vmem:[%s2054_s2 + $0x108] sm:$0xff]  ;;  %v953_v9 = vld [vmem:[%s2054_s2 + $0x110] sm:$0xff] }
   0xa   :  { %v1207_v40 = vld [vmem:[%s2054_s2 + $0x68] sm:$0xff] }
  0xdb   :  { %v1666_v6 = vpop.f32.mrb[0].mxu0 }
  0xdc   :  { %v93_v7 = vpop.f32.mrb[1].mxu0 }
  0xdd   :  { %1669 = vmatprep.mubr.msk.f32.mxu1 %vm106_vm2, %v93_v7  ;;  %v1566_v7 = vld [vmem:[%s2054_s2 + $0x50] ss:$0 sm:$0xff] }
  0xde   :  { %1670 = vmatmul.mubr.msk.f32.vlgmr.msra.gmra.mrb[0].mxu1 %vm106_vm2, %v1666_v6  ;;  %v860_v6 = vld [vmem:[%s2054_s2 + $0xe8] sm:$0xff] }
  0xdf   :  { %1795 = vmatpush3.bf16.msra.mxu1 %v1792_v10 }
  0xe0   :  { %1686 = vmatprep.subr.mxu1 %v359_v21 }
 0x1b1   :  { %v1671_v12 = vpop.f32.mrb[0].mxu1 }
 0x1b2   :  { %v189_v13 = vadd.f32 %v1671_v12, %v1545_v11  ;;  %v183_v14 = vpop.f32.mrb[1].mxu1 }
 0x1b3   :  { %v184_v15 = vadd.f32 %v1545_v11, %v183_v14  ;;  %v861_v14 = vld [vmem:[%s2054_s2 + $0xf0] sm:$0xff] }
 0x1b4   :  { %v193_v17 = vmax.f32 %v189_v13, 0.0  ;;  %v1823_v13 = vpack.c.bf16 %v953_v9, %v952_v8 }
 0x1b5   :  { %v192_v16 = vmax.f32 %v184_v15, 0.0  ;;  %v954_v15 = vld [vmem:[%s2054_s2 + $0x118] sm:$0xff] }
 0x1b7   :  { %1676 = vmatprep.mubr.msk.f32.mxu1 %vm20_vm0, %v192_v16  ;;  %v955_v16 = vld [vmem:[%s2054_s2 + $0x120] sm:$0xff] }
 0x1b8   :  { %1677 = vmatmul.mubr.msk.f32.vlgmr.msra.gmra.mrb[2].mxu1 %vm20_vm0, %v193_v17  ;;  %v1827_v17 = vpack.c.bf16 %v955_v16, %v954_v15 }
 0x1b9   :  { %1687 = vmatpush3.msra.mxu1 %v359_v21 }
 0x1ba   :  { %1698 = vmatprep.subr.msk.mxu1 %vm113_vm1, %v522_v32 }
 0x28b   :  { %v1678_v18 = vpop.f32.mrb[2].mxu1 }
 0x28c   :  { %v269_v19 = vpop.f32.mrb[3].mxu1 }
 0x28d   :  { %v1796_v20 = vpack.c.bf16 %v1678_v18, %v269_v19  ;;  %v948_v18 = vld [vmem:[%s2054_s2 + $0xf8] sm:$0xff] }
 0x28f   :  { %1797 = vmatprep.subr.bf16.mxu0 %v1796_v20 }
 0x290   :  { %1799 = vmatpush3.bf16.msra.mxu0 %v1796_v20  ;;  %v949_v20 = vld [vmem:[%s2054_s2 + $0x100] sm:$0xff] }
 0x293   :  { %1684 = vmatmul.mubr.msk.f32.vlgmr.msra.gmra.mrb[2].mxu0 %vm20_vm0, %v1889_v4 }
 0x294   :  { %1695 = vmatprep.mubr.msk.f32.mxu0 %vm20_vm0, %v1882_v2 }
 0x366   :  { %v1685_v23 = vpop.f32.mrb[2].mxu0 }
 0x367   :  { %v354_v24 = vadd.f32 %v1685_v23, %v1551_v22  ;;  %v348_v25 = vpop.f32.mrb[3].mxu0 }
 0x368   :  { %v349_v26 = vadd.f32 %v1551_v22, %v348_v25 }
 0x369   :  { %v358_v28 = vmax.f32 %v354_v24, 0.0 }
 0x36a   :  { %v357_v27 = vmax.f32 %v349_v26, 0.0 }
 0x36c   :  { %1688 = vmatprep.mubr.msk.f32.mxu1 %vm361_vm3, %v357_v27 }
 0x36d   :  { %1689 = vmatmul.mubr.msk.f32.vlgmr.msra.gmra.mrb[4].mxu1 %vm361_vm3, %v358_v28 }
 0x36e   :  { %1699 = vmatpush3.msk.msra.mxu1 %vm113_vm1, %v522_v32  ;;  %v1575_v32 = vld [vmem:[%s2054_s2 + $0x60] ss:$0 sm:$0xff] }
 0x36f   :  { %1820 = vmatprep.subr.bf16.mxu1 %v1850_v56 }
 0x440   :  { %v1690_v29 = vpop.f32.mrb[4].mxu1 }
 0x441   :  { %v434_v30 = vpop.f32.mrb[5].mxu1 }
 0x442   :  { %v1800_v31 = vpack.c.bf16 %v1690_v29, %v434_v30  ;;  %v1040_v29 = vld [vmem:[%s2054_s2 + $0x58] sm:$0xf] }
 0x444   :  { %1801 = vmatprep.subr.bf16.mxu0 %v1800_v31 }
 0x445   :  { %1803 = vmatpush3.bf16.msra.mxu0 %v1800_v31 }
 0x446   :  { %1805 = vmatprep.subr.bf16.mxu0 %v1804_v36 }
 0x448   :  { %1696 = vmatmul.mubr.msk.f32.vlgmr.msra.gmra.mrb[4].mxu0 %vm20_vm0, %v1889_v4 }
 0x449   :  { %1807 = vmatpush3.bf16.msra.mxu0 %v1804_v36 }
 0x44a   :  { %1809 = vmatprep.subr.bf16.mxu0 %v1808_v38 }
 0x44d   :  { %1811 = vmatpush3.bf16.msra.mxu0 %v1808_v38 }
 0x44e   :  { %1813 = vmatprep.subr.bf16.mxu0 %v1812_v41 }
 0x451   :  { %1815 = vmatpush3.bf16.msra.mxu0 %v1812_v41 }
 0x452   :  { %1817 = vmatprep.subr.bf16.mxu0 %v1816_v49 }
 0x455   :  { %1819 = vmatpush3.bf16.msra.mxu0 %v1816_v49 }
 0x51b   :  { %v1697_v43 = vpop.f32.mrb[4].mxu0 }
 0x51c   :  { %v513_v44 = vpop.f32.mrb[5].mxu0  ;;  %v519_v46 = vadd.f32 %v1697_v43, %v1556_v42  ;;  %v1371_v43 = vld [vmem:[%s2054_s2 + $0x78] sm:$0xff] }
 0x51d   :  { %v514_v45 = vadd.f32 %v1556_v42, %v513_v44  ;;  %v1372_v44 = vld [vmem:[%s2054_s2 + $0x80] sm:$0xff] }
 0x51f   :  { %1700 = vmatprep.mubr.msk.f32.mxu1 %vm106_vm2, %v514_v45  ;;  %v1839_v45 = vpack.c.bf16 %v1372_v44, %v1371_v43 }
 0x520   :  { %1701 = vmatmul.mubr.msk.f32.vlgmr.msra.gmra.mrb[6].mxu1 %vm106_vm2, %v519_v46  ;;  %v1581_v46 = vld [vmem:[%s2054_s2 + $0x70] ss:$0 sm:$0xff] }
 0x521   :  { %1726 = vmatprep.mubr.msk.f32.mxu1 %vm1851_vm5, %v1852_v57 }
 0x5f3   :  { %v1702_v51 = vpop.f32.mrb[6].mxu1 }
 0x5f4   :  { %v598_v53 = vpop.f32.mrb[7].mxu1  ;;  %v610_v55 = vmul.f32 %v1702_v51, %v608_v52 }
 0x5f5   :  { %v609_v54 = vmul.f32 %v607_v50, %v598_v53 }
 0x5f7   :  { %1719 = vmatprep.mubr.msk.f32.mxu0 %vm619_vm4, %v609_v54 }
 0x5f8   :  { %1720 = vmatmul.mubr.msk.f32.vlgmr.msra.gmra.mrb[6].mxu0 %vm619_vm4, %v610_v55  ;;  %v1586_v55 = vld [vmem:[%s2054_s2 + $0x88] ss:$0 sm:$0xff] }
 0x5f9   :  { %1754 = vmatprep.mubr.msk.f32.mxu0 %vm20_vm0, %v1882_v2 }
 0x6cb   :  { %v1721_v58 = vpop.f32.mrb[6].mxu0 }
 0x6cc   :  { %v692_v59 = vpop.f32.mrb[7].mxu0 }
 0x6cd   :  { %v1821_v60 = vpack.c.bf16 %v1721_v58, %v692_v59 }
 0x6cf   :  { %1822 = vmatpush3.bf16.msra.mxu1 %v1821_v60 }
 0x6d0   :  { %1729 = vmatprep.subr.mxu1 %v1852_v57 }
 0x6d2   :  { %1727 = vmatmul.mubr.msk.f32.vlgmr.msra.gmra.mrb[8].mxu1 %vm20_vm0, %v701_v61 }
 0x6d3   :  { %1731 = vmatprep.mubr.msk.f32.mxu1 %vm1851_vm5, %v1852_v57  ;;  %1730 = vmatpush3.msra.mxu1 %v781_v62 }
 0x7a5   :  { %v776_v0 = vpop.f32.mrb[8].mxu1 }
 0x7a6   :  { %v777_v1 = vadd.f32 %v1564_v63, %v776_v0  ;;  %v1728_v3 = vpop.f32.mrb[9].mxu1 }
 0x7a8   :  { %v780_v5 = vmax.f32 %v777_v1, 0.0 }
 0x7aa   :  { %1732 = vmatmul.mubr.msk.f32.vlgmr.msra.gmra.mrb[10].mxu1 %vm361_vm3, %v780_v5 }
 0x7ab   :  { %1736 = vmatprep.mubr.msk.f32.mxu1 %vm862_vm6, %v860_v6 }
 0x87d   :  { %v856_v10 = vpop.f32.mrb[10].mxu1 }
 0x87e   :  { %v857_v11 = vadd.f32 %v1566_v7, %v856_v10  ;;  %v1733_v12 = vpop.f32.mrb[11].mxu1 }
 0x880   :  { %1734 = vmatprep.subr.msk.mxu1 %vm869_vm7, %v857_v11 }
 0x881   :  { %1735 = vmatpush3.msk.msra.mxu1 %vm869_vm7, %v857_v11 }
 0x882   :  { %1737 = vmatmul.mubr.msk.f32.vlgmr.msra.gmra.mrb[12].mxu1 %vm862_vm6, %v861_v14  ;;  %1824 = vmatprep.subr.bf16.mxu1 %v1823_v13 }
 0x883   :  { %1826 = vmatpush3.bf16.msra.mxu1 %v1823_v13 }
 0x884   :  { %1828 = vmatprep.subr.bf16.mxu1 %v1827_v17 }
 0x887   :  { %1830 = vmatpush3.bf16.msra.mxu1 %v1827_v17 }
 0x955   :  { %v1738_v19 = vpop.f32.mrb[12].mxu1 }
 0x956   :  { %v939_v21 = vpop.f32.mrb[13].mxu1  ;;  %v951_v23 = vmul.f32 %v1738_v19, %v949_v20 }
 0x957   :  { %v950_v22 = vmul.f32 %v948_v18, %v939_v21 }
 0x959   :  { %1747 = vmatprep.mubr.msk.f32.mxu1 %vm956_vm8, %v950_v22 }
 0x95a   :  { %1748 = vmatmul.mubr.msk.f32.vlgmr.msra.gmra.mrb[14].mxu1 %vm956_vm8, %v951_v23 }
 0x95b   :  { %1766 = vmatprep.mubr.msk.f32.mxu1 %vm20_vm0, %v1882_v2 }
 0xa2d   :  { %v1749_v24 = vpop.f32.mrb[14].mxu1 }
 0xa2e   :  { %v1039_v25 = vmax.f32 %v1749_v24, 0.0  ;;  %v1029_v26 = vpop.f32.mrb[15].mxu1 }
 0xa2f   :  { %v1038_v27 = vmax.f32 %v1029_v26, 0.0 }
 0xa31   :  { %v1831_v28 = vpack.c.bf16 %v1039_v25, %v1038_v27 }
 0xa33   :  { %1832 = vmatprep.subr.bf16.mxu0 %v1831_v28 }
 0xa34   :  { %1834 = vmatpush3.bf16.msra.mxu0 %v1831_v28 }
 0xa35   :  { %1757 = vmatprep.subr.msk.mxu0 %vm113_vm1, %v1040_v29 }
 0xa37   :  { %1755 = vmatmul.mubr.msk.f32.vlgmr.msra.gmra.mrb[8].mxu0 %vm20_vm0, %v1889_v4 }
 0xa38   :  { %1758 = vmatpush3.msk.msra.mxu0 %vm113_vm1, %v1040_v29 }
 0xa39   :  { %1769 = vmatprep.subr.mxu0 %v1207_v40 }
 0xb0a   :  { %v1756_v30 = vpop.f32.mrb[8].mxu0 }
 0xb0b   :  { %v1108_v31 = vpop.f32.mrb[9].mxu0 }
 0xb0c   :  { %1759 = vmatprep.mubr.msk.f32.mxu0 %vm106_vm2, %v1108_v31 }
 0xb0d   :  { %1760 = vmatmul.mubr.msk.f32.vlgmr.msra.gmra.mrb[10].mxu0 %vm106_vm2, %v1756_v30 }
 0xb0e   :  { %1770 = vmatpush3.msra.mxu0 %v1207_v40 }
 0xbe0   :  { %v1761_v33 = vpop.f32.mrb[10].mxu0 }
 0xbe1   :  { %v1202_v34 = vadd.f32 %v1761_v33, %v1575_v32  ;;  %v1196_v35 = vpop.f32.mrb[11].mxu0 }
 0xbe2   :  { %v1197_v36 = vadd.f32 %v1575_v32, %v1196_v35 }
 0xbe3   :  { %v1206_v37 = vmax.f32 %v1202_v34, 0.0 }
 0xbe4   :  { %v1205_v38 = vmax.f32 %v1197_v36, 0.0 }
 0xbe6   :  { %v1835_v39 = vpack.c.bf16 %v1206_v37, %v1205_v38 }
 0xbe8   :  { %1836 = vmatprep.subr.bf16.mxu1 %v1835_v39 }
 0xbe9   :  { %1838 = vmatpush3.bf16.msra.mxu1 %v1835_v39 }
 0xbea   :  { %1840 = vmatprep.subr.bf16.mxu1 %v1839_v45 }
 0xbec   :  { %1767 = vmatmul.mubr.msk.f32.vlgmr.msra.gmra.mrb[16].mxu1 %vm20_vm0, %v1889_v4 }
 0xbed   :  { %1842 = vmatpush3.bf16.msra.mxu1 %v1839_v45 }
 0xcbf   :  { %v1768_v41 = vpop.f32.mrb[16].mxu1 }
 0xcc0   :  { %v1275_v42 = vpop.f32.mrb[17].mxu1 }
 0xcc1   :  { %1771 = vmatprep.mubr.msk.f32.mxu0 %vm361_vm3, %v1275_v42 }
 0xcc2   :  { %1772 = vmatmul.mubr.msk.f32.vlgmr.msra.gmra.mrb[12].mxu0 %vm361_vm3, %v1768_v41 }
 0xcc3   :  { %1785 = vmatprep.mubr.msk.f32.mxu0 %vm20_vm0, %v1882_v2 }
 0xd95   :  { %v1773_v47 = vpop.f32.mrb[12].mxu0 }
 0xd96   :  { %v1366_v48 = vadd.f32 %v1773_v47, %v1581_v46  ;;  %v1360_v49 = vpop.f32.mrb[13].mxu0 }
 0xd97   :  { %v1361_v50 = vadd.f32 %v1581_v46, %v1360_v49 }
 0xd98   :  { %v1370_v51 = vmax.f32 %v1366_v48, 0.0 }
 0xd99   :  { %v1369_v2 = vmax.f32 %v1361_v50, 0.0 }
 0xd9b   :  { %1778 = vmatprep.mubr.msk.f32.mxu1 %vm20_vm0, %v1369_v2 }
 0xd9c   :  { %1779 = vmatmul.mubr.msk.f32.vlgmr.msra.gmra.mrb[18].mxu1 %vm20_vm0, %v1370_v51 }
 0xe6f   :  { %v1780_v52 = vpop.f32.mrb[18].mxu1 }
 0xe70   :  { %v1446_v53 = vpop.f32.mrb[19].mxu1 }
 0xe71   :  { %v1843_v54 = vpack.c.bf16 %v1780_v52, %v1446_v53 }
 0xe73   :  { %1844 = vmatprep.subr.bf16.mxu0 %v1843_v54 }
 0xe74   :  { %1846 = vmatpush3.bf16.msra.mxu0 %v1843_v54 }
 0xe77   :  { %1786 = vmatmul.mubr.msk.f32.vlgmr.msra.gmra.mrb[14].mxu0 %vm20_vm0, %v1889_v4 }
 0xf4a   :  { %v1787_v56 = vpop.f32.mrb[14].mxu0 }
 0xf4b   :  { %v1531_v57 = vadd.f32 %v1787_v56, %v1586_v55  ;;  %v1525_v58 = vpop.f32.mrb[15].mxu0 }
 0xf4c   :  { %v1526_v59 = vadd.f32 %v1586_v55, %v1525_v58 }
 0xf4d   :  { %v1535_v60 = vmax.f32 %v1531_v57, 0.0 }
 0xf4e   :  { %v1534_v61 = vmax.f32 %v1526_v59, 0.0 }
 0xf4f   :  { %1538 = vst.msk [vmem:[%s2055_s3 + $0x8] sm:$0xff] %vm1536_vm9, %v1535_v60 }
 0xf50   :  { %1537 = vst.msk [vmem:[%s2055_s3] sm:$0xff] %vm1536_vm9, %v1534_v61 }

</bundles_post_ra>
